<compile_context>
chip_gen: v6e
topology: v6e:2x2x1
jax: 0.10.0
libtpu: 0.0.40
codegen_flags: <defaults>
</compile_context>

<pallas_src>
import functools
import math

import jax
import jax.numpy as jnp
from jax.experimental import pallas as pl
from jax.experimental.pallas import tpu as pltpu


def _round_up(v, m):
    return ((v + m - 1) // m) * m


def _spatial_attn_kernel(x2_ref, kt_ref, vt_ref, bt_ref, o_ref, *,
                         tb, n, fp, approx_recip):
    """One grid step: tb slices -> tb attention maps.

    x2_ref: (tb*fp, N) compute dtype; row (b, f) holds x[b, :, f].
    kt_ref: (N, N) K^T;  vt_ref: (N, N) V^T   (compute dtype).
    bt_ref: (N, N) bias^T (float32).
    o_ref : (tb, N*N) float32; row b = S_Attn[b] flattened (n-major, k-minor).
    """
    f32 = jnp.float32
    cdt = kt_ref.dtype

    x2 = x2_ref[...]                                    # (tb*fp, N)
    kt = kt_ref[...]                                    # K^T
    vt = vt_ref[...]                                    # V^T
    bT = bt_ref[...].astype(f32)                        # bias^T

    # (i) kx for ALL tb slices in one MXU matmul (batch folded into rows):
    #     kx2[(b,f), k] = sum_m x[b,m,f] * K[k,m]
    kx2 = jnp.dot(x2, kt, preferred_element_type=f32)   # (tb*fp, N) f32

    # Sublane-aligned unfolds (fp is a multiple of the sublane tile) plus one
    # small minor-dim (XLU) transpose; no lane-splitting reshapes.
    x_t = x2.reshape(tb, fp, n)                         # x_t[b,f,m]
    kx_t = kx2.reshape(tb, fp, n)                       # kx_t[b,f,k]
    kx_b = jnp.transpose(kx_t, (0, 2, 1)).astype(cdt)   # kx_b[b,k,f]

    # (ii) product^T[b,k,m] = sum_f kx[b,k,f] * x[b,m,f]
    #      (per-slice Gram-like matmul: inherently batched; standard
    #       leading-batch matmul form.)
    prod_t = jnp.einsum("bkf,bfm->bkm", kx_b, x_t,
                        preferred_element_type=f32)     # (tb, N, N) f32

    # tanh(product + bias), kept in the k-major layout the V matmul consumes.
    t_t = jnp.tanh(prod_t + bT[None, :, :])             # t_t[b,k,m] f32

    # (iii) score for ALL tb slices in one MXU matmul:
    #       s2[(b,k), n] = sum_m tanh(product+b)[b,m,k] * V[n,m]
    s2 = jnp.dot(t_t.reshape(tb * n, n).astype(cdt), vt,
                 preferred_element_type=f32)            # (tb*N, N) f32
    score = jnp.transpose(s2.reshape(tb, n, n), (0, 2, 1))   # score[b,n,k]

    # Softmax over k (last axis); reciprocal goes to the EUP slot.
    m_ = jnp.max(score, axis=-1, keepdims=True)
    e = jnp.exp(score - m_)
    den = jnp.sum(e, axis=-1, keepdims=True)
    attn = e * pl.reciprocal(den, approx=approx_recip)  # (tb, N, N)

    # Single lane-dense, full-width store (one relayout, no masked vst loop).
    o_ref[...] = attn.reshape(tb, n * n).astype(o_ref.dtype)


def _pick_tb(bt, n, fp, itemsize, vmem_budget, tb_cap, min_grid_steps):
    """Largest multiple-of-8 tb whose per-step footprint fits the VMEM budget,
    additionally capped so the grid keeps >= min_grid_steps steps."""
    lane = lambda d: _round_up(d, 128)

    def step_bytes(tb):
        x_blk = 2 * tb * fp * lane(n) * itemsize        # double-buffered input
        o_blk = 2 * tb * lane(n * n) * 4                # double-buffered output
        inter = 6 * tb * n * lane(n) * 4 + 3 * tb * fp * lane(n) * 4
        return x_blk + o_blk + inter

    hi = min(max(8, _round_up(bt, 8)), 4096)
    if tb_cap is not None:
        hi = min(hi, max(8, (tb_cap // 8) * 8))
    tb = 8
    while tb + 8 <= hi and step_bytes(tb + 8) <= vmem_budget:
        tb += 8
    if min_grid_steps > 1:
        # Keep >= min_grid_steps steps when bt allows it (v7x: 2 TensorCores
        # can shard the "parallel" grid axis).
        tb = min(tb, max(8, _round_up(-(-bt // min_grid_steps), 8)))
    return tb


def spatial_attention(x, K, V, b, *,
                      compute_dtype=jnp.float32,
                      tb_cap=None,
                      approx_softmax=None,
                      min_grid_steps=2):
    """x: (B, T, N, Fin); K, V: (N, N); b: (1, N, N)  ->  (B, T, N, N) float32."""
    B, T, N, Fin = x.shape
    cdt = jnp.dtype(compute_dtype)
    sub = 8 if cdt.itemsize >= 4 else 16                 # f32 / bf16 sublane tile
    assert N % sub == 0, "pad N (and mask the softmax) for ragged N"
    BT = B * T
    fp = _round_up(max(Fin, 1), sub)                     # zero-padded feature dim

    if approx_softmax is None:
        # exact reciprocal for the f32 path (tight reference match), approx for bf16.
        approx_softmax = cdt != jnp.dtype(jnp.float32)

    # Generation-aware VMEM budget (v5e/v6e: 128 MiB, v7x: 64 MiB fallback).
    vmem_cap = 64 << 20
    try:
        info_fn = getattr(pltpu, "get_tpu_info", None)
        if info_fn is not None:
            vmem_cap = int(getattr(info_fn(), "vmem_capacity_bytes", vmem_cap))
    except Exception:
        pass
    budget = max(4 << 20, min(vmem_cap // 3, 48 << 20))

    tb = _pick_tb(BT, N, fp, cdt.itemsize, budget, tb_cap, min_grid_steps)
    bt_pad = _round_up(BT, tb)

    # Wrapper-side layout plumbing (HBM side, cheap under XLA):
    #   x -> (bt_pad, N, fp) -> (bt_pad, fp, N) -> (bt_pad*fp, N)
    xf = x.reshape(BT, N, Fin).astype(cdt)
    if fp != Fin:
        xf = jnp.pad(xf, ((0, 0), (0, 0), (0, fp - Fin)))   # zero features are benign
    if bt_pad != BT:
        xf = jnp.pad(xf, ((0, bt_pad - BT), (0, 0), (0, 0)))  # zero slices sliced off
    x2 = jnp.transpose(xf, (0, 2, 1)).reshape(bt_pad * fp, N)
    KT = jnp.transpose(K).astype(cdt)
    VT = jnp.transpose(V).astype(cdt)
    bT = jnp.transpose(b.reshape(N, N)).astype(jnp.float32)

    kernel = functools.partial(_spatial_attn_kernel, tb=tb, n=N, fp=fp,
                               approx_recip=bool(approx_softmax))

    flops = 4 * bt_pad * N * N * fp + 2 * bt_pad * N * N * N
    transcendentals = 2 * bt_pad * N * N + bt_pad * N
    bytes_accessed = (x2.size * x2.dtype.itemsize
                      + bt_pad * N * N * 4
                      + 3 * N * N * 4)
    cost = pl.CostEstimate(flops=int(flops),
                           transcendentals=int(transcendentals),
                           bytes_accessed=int(bytes_accessed))

    vmem_limit = int(max(16 << 20,
                         min(max(32 << 20, 2 * budget), int(0.75 * vmem_cap))))

    out = pl.pallas_call(
        kernel,
        out_shape=jax.ShapeDtypeStruct((bt_pad, N * N), jnp.float32),
        grid_spec=pltpu.PrefetchScalarGridSpec(
            num_scalar_prefetch=0,
            grid=(bt_pad // tb,),
            in_specs=[
                pl.BlockSpec((tb * fp, N), lambda i: (i, 0)),
                pl.BlockSpec((N, N), lambda i: (0, 0)),
                pl.BlockSpec((N, N), lambda i: (0, 0)),
                pl.BlockSpec((N, N), lambda i: (0, 0)),
            ],
            out_specs=pl.BlockSpec((tb, N * N), lambda i: (i, 0)),
        ),
        compiler_params=pltpu.CompilerParams(
            dimension_semantics=("parallel",),   # megacore-shardable on v7x
            vmem_limit_bytes=vmem_limit),
        cost_estimate=cost,
    )(x2, KT, VT, bT)

    return out[:BT].reshape(B, T, N, N)


def _xavier_normal(key, shape, fan_in, fan_out):
    std = math.sqrt(2.0 / float(fan_in + fan_out))
    return std * jax.random.normal(key, shape, dtype=jnp.float32)


def _reference(x, K, V, b):
    # Pure-JAX reference mirroring the PyTorch forward (eval mode).
    B, T, N, Fin = x.shape
    xf = x.reshape(-1, N, Fin)
    kx = jnp.einsum("nm,bmf->bnf", K, xf)               # K @ x
    product = jnp.einsum("bnf,bmf->bnm", xf, kx)        # x @ (Kx)^T
    score = jnp.einsum("nm,bmk->bnk", V, jnp.tanh(product + b))
    attn = jax.nn.softmax(score, axis=-1)
    return attn.reshape(B, T, N, N)


if __name__ == "__main__":
    # Small shapes consistent with the module: B=2, T=8, N=16 vertices, Fin=4.
    B, T, N, Fin = 2, 8, 16, 4

    key = jax.random.PRNGKey(0)
    kx_key, kv_key, kb_key, kdata_key = jax.random.split(key, 4)

    K = _xavier_normal(kx_key, (N, N), fan_in=N, fan_out=N)
    V = _xavier_normal(kv_key, (N, N), fan_in=N, fan_out=N)
    b = _xavier_normal(kb_key, (1, N, N), fan_in=N * N, fan_out=N)

    x = jax.random.normal(kdata_key, (B, T, N, Fin), dtype=jnp.float32)

    ref = _reference(x, K, V, b)

    # Full-precision path (exact reciprocal): tight tolerance.
    out = jax.block_until_ready(spatial_attention(x, K, V, b))
    assert out.shape == (B, T, N, N)
    assert jnp.allclose(out, ref, atol=1e-5, rtol=1e-5)

    # bf16 MXU-input path (f32 accumulation / f32 tanh+softmax, approx recip):
    # v6e/v7x fast path; rows may not sum to exactly 1 within bf16 rounding.
    out_bf16 = jax.block_until_ready(
        spatial_attention(x, K, V, b, compute_dtype=jnp.bfloat16))
    assert out_bf16.shape == (B, T, N, N)
    assert jnp.allclose(out_bf16, ref, atol=5e-2, rtol=0.0)

    print("KERNEL_OK")
</pallas_src>

<mosaic_0001>
module attributes {stable_mosaic.version = 11 : i64} {
  func.func @_spatial_attn_kernel(%arg0: i32, %arg1: memref<64x16xf32, #tpu.memory_space<vmem>>, %arg2: memref<16x16xf32, #tpu.memory_space<vmem>>, %arg3: memref<16x16xf32, #tpu.memory_space<vmem>>, %arg4: memref<16x16xf32, #tpu.memory_space<vmem>>, %arg5: memref<8x256xf32, #tpu.memory_space<vmem>>) attributes {dimension_semantics = [#tpu.dimension_semantics<parallel>], iteration_bounds = array<i64: 2>, scalar_prefetch = 0 : i64, scratch_operands = 0 : i64, tpu.core_type = #tpu.core_type<tc>, window_params = [{transform_indices = @transform_0, window_bounds = array<i64: 64, 16>}, {pipeline_mode = #tpu.pipeline_mode<synchronous>, transform_indices = @transform_1, window_bounds = array<i64: 16, 16>}, {pipeline_mode = #tpu.pipeline_mode<synchronous>, transform_indices = @transform_2, window_bounds = array<i64: 16, 16>}, {pipeline_mode = #tpu.pipeline_mode<synchronous>, transform_indices = @transform_3, window_bounds = array<i64: 16, 16>}, {transform_indices = @transform_4, window_bounds = array<i64: 8, 256>}]} {
    %c0 = arith.constant 0 : index
    %c0_0 = arith.constant 0 : index
    %0 = vector.load %arg1[%c0, %c0_0] : memref<64x16xf32, #tpu.memory_space<vmem>>, vector<64x16xf32>
    %c0_1 = arith.constant 0 : index
    %c0_2 = arith.constant 0 : index
    %1 = vector.load %arg2[%c0_1, %c0_2] : memref<16x16xf32, #tpu.memory_space<vmem>>, vector<16x16xf32>
    %c0_3 = arith.constant 0 : index
    %c0_4 = arith.constant 0 : index
    %2 = vector.load %arg3[%c0_3, %c0_4] : memref<16x16xf32, #tpu.memory_space<vmem>>, vector<16x16xf32>
    %c0_5 = arith.constant 0 : index
    %c0_6 = arith.constant 0 : index
    %3 = vector.load %arg4[%c0_5, %c0_6] : memref<16x16xf32, #tpu.memory_space<vmem>>, vector<16x16xf32>
    %cst = arith.constant dense<0.000000e+00> : vector<64x16xf32>
    %4 = tpu.matmul %0, %1, %cst {dimension_numbers = #tpu.dot_dimension_numbers<[1], [0], [0], [1], [0, 0, 1, 1], [], []>} : vector<64x16xf32>, vector<16x16xf32>, vector<64x16xf32> -> vector<64x16xf32>
    %5 = vector.shape_cast %0 : vector<64x16xf32> to vector<8x8x16xf32>
    %6 = vector.shape_cast %4 : vector<64x16xf32> to vector<8x8x16xf32>
    %7 = tpu.transpose %6, [0, 2, 1] : vector<8x8x16xf32> -> vector<8x16x8xf32>
    "tpu.trace_start"() <{level = 10 : i32, message = "bkf,bfm->bkm"}> : () -> ()
    %cst_7 = arith.constant dense<0.000000e+00> : vector<8x16x16xf32>
    %8 = tpu.matmul %7, %5, %cst_7 {dimension_numbers = #tpu.dot_dimension_numbers<[2], [1], [1], [2], [0, 0, 0, 1, 1, 2], [0], [0]>} : vector<8x16x8xf32>, vector<8x8x16xf32>, vector<8x16x16xf32> -> vector<8x16x16xf32>
    "tpu.trace_stop"() : () -> ()
    %9 = vector.shape_cast %3 : vector<16x16xf32> to vector<1x16x16xf32>
    %10 = vector.broadcast %9 : vector<1x16x16xf32> to vector<8x16x16xf32>
    %11 = arith.addf %8, %10 : vector<8x16x16xf32>
    %12 = math.tanh %11 : vector<8x16x16xf32>
    %13 = vector.shape_cast %12 : vector<8x16x16xf32> to vector<128x16xf32>
    %cst_8 = arith.constant dense<0.000000e+00> : vector<128x16xf32>
    %14 = tpu.matmul %13, %2, %cst_8 {dimension_numbers = #tpu.dot_dimension_numbers<[1], [0], [0], [1], [0, 0, 1, 1], [], []>} : vector<128x16xf32>, vector<16x16xf32>, vector<128x16xf32> -> vector<128x16xf32>
    %15 = vector.shape_cast %14 : vector<128x16xf32> to vector<8x16x16xf32>
    %16 = tpu.transpose %15, [0, 2, 1] : vector<8x16x16xf32> -> vector<8x16x16xf32>
    %cst_9 = arith.constant dense<0xFF800000> : vector<8x16xf32>
    %17 = vector.multi_reduction <maximumf>, %16, %cst_9 [2] : vector<8x16x16xf32> to vector<8x16xf32>
    %18 = vector.shape_cast %17 : vector<8x16xf32> to vector<8x16x1xf32>
    %19 = vector.broadcast %18 : vector<8x16x1xf32> to vector<8x16x16xf32>
    %20 = arith.subf %16, %19 : vector<8x16x16xf32>
    %21 = math.exp %20 : vector<8x16x16xf32>
    %cst_10 = arith.constant dense<0.000000e+00> : vector<8x16xf32>
    %22 = vector.multi_reduction <add>, %21, %cst_10 [2] : vector<8x16x16xf32> to vector<8x16xf32>
    %23 = vector.shape_cast %22 : vector<8x16xf32> to vector<8x16x1xf32>
    %24 = tpu.reciprocal %23 : vector<8x16x1xf32> -> vector<8x16x1xf32>
    %25 = vector.broadcast %24 : vector<8x16x1xf32> to vector<8x16x16xf32>
    %26 = arith.mulf %21, %25 : vector<8x16x16xf32>
    %27 = vector.shape_cast %26 : vector<8x16x16xf32> to vector<8x256xf32>
    %c0_11 = arith.constant 0 : index
    %c0_12 = arith.constant 0 : index
    %28 = vector.load %arg5[%c0_11, %c0_12] : memref<8x256xf32, #tpu.memory_space<vmem>>, vector<8x256xf32>
    tpu.vector_store %arg5[%c0_11, %c0_12], %27 {strides = array<i32>} : memref<8x256xf32, #tpu.memory_space<vmem>>, vector<8x256xf32>,
    return
  }
  func.func @transform_0(%arg0: i32) -> (i32, i32) {
    %c0_i32 = arith.constant 0 : i32
    %c0_i32_0 = arith.constant 0 : i32
    return %arg0, %c0_i32 : i32, i32
  }
  func.func @transform_1(%arg0: i32) -> (i32, i32) {
    %c0_i32 = arith.constant 0 : i32
    %c0_i32_0 = arith.constant 0 : i32
    %c0_i32_1 = arith.constant 0 : i32
    return %c0_i32, %c0_i32_0 : i32, i32
  }
  func.func @transform_2(%arg0: i32) -> (i32, i32) {
    %c0_i32 = arith.constant 0 : i32
    %c0_i32_0 = arith.constant 0 : i32
    %c0_i32_1 = arith.constant 0 : i32
    return %c0_i32, %c0_i32_0 : i32, i32
  }
  func.func @transform_3(%arg0: i32) -> (i32, i32) {
    %c0_i32 = arith.constant 0 : i32
    %c0_i32_0 = arith.constant 0 : i32
    %c0_i32_1 = arith.constant 0 : i32
    return %c0_i32, %c0_i32_0 : i32, i32
  }
  func.func @transform_4(%arg0: i32) -> (i32, i32) {
    %c0_i32 = arith.constant 0 : i32
    %c0_i32_0 = arith.constant 0 : i32
    return %arg0, %c0_i32 : i32, i32
  }
}

</mosaic_0001>

<bundles_post_ra>
// kernel: tpu_custom_call.1
= control target key start
LH: loop header
LB: loop body
LE: loop exit
PB: predicated region body
PF: predicated region fallthrough
CT: control target
= control target key end

     0   :  { %9 = vsyncpa [#allocation3], 0  ;;  %s3111_s0 = inlined_call_operand.vmem [shape: f32[128,16], index: 0, kind: input, shape index: {}]   ;;  %s3112_s1 = inlined_call_operand.vmem [shape: f32[16,16], index: 1, kind: input, shape index: {}]   ;;  %s3113_s2 = inlined_call_operand.vmem [shape: f32[16,16], index: 2, kind: input, shape index: {}]   ;;  %s3114_s3 = inlined_call_operand.vmem [shape: f32[16,16], index: 3, kind: input, shape index: {}]   ;;  %s3115_s4 = inlined_call_operand.hbm [shape: f32[16,256], index: 4, kind: output, shape index: {}]  }
   0x1   :  { %11 = vsyncpa [#allocation3 + $0x1], 0  ;;  %s2747_s15 = smov 0   ;;  %s2749_s16 = smov 0  }
   0x2   :  { %s2751_s17 = smov 0   ;;  %s2753_s18 = smov 0  }
   0x3 LB: > { %s2768_s19 = sadd.s32 4294967295, %s2710_s18   ;;  %s2312_s20 = sadd.s32 4294967294, %s2710_s18   ;;  %s2710_s18 = sphi %s2753_s18, %s3121_s18   ;;  %s2706_s17 = sphi %s2751_s17, %s3120_s17   ;;  %s2702_s16 = sphi %s2749_s16, %s3119_s16   ;;  %s2698_s15 = sphi %s2747_s15, %s3118_s15  }
   0x4   : > { %s2772_s21 = sadd.s32 1, %s2710_s18   ;;  %s113_s22 = sadd.s32 1, %s2706_s17 }
   0x5   : > { %s110_s23 = ssub.s32 %s2710_s18, %s2772_s21  ;;  %p123_p0 = scmp.ne.s32.totalorder %s2706_s17, %s2702_s16 }
   0x6   : > { %p111_p1 = scmp.eq.s32.totalorder %s110_s23, 0  ;;  %p124_p2 = scmp.eq.s32.totalorder %s2768_s19, 1 }
   0x7   : > { %p129_p3 = scmp.ne.s32.totalorder %s2702_s16, %s2698_s15  ;;  %p130_p4 = scmp.eq.s32.totalorder %s2312_s20, 1 }
   0x8   : > { %s2783_s24 = scalar_select %p111_p1, %s2706_s17, %s113_s22  }
   0x9   : > { %p2785_p5 = por %p124_p2, %p123_p0  ;;  %p2789_p6 = por %p130_p4, %p129_p3 }
   0xa   : > { %p2315_p7 = scmp.ge.s32.totalorder %s2710_s18, 1  ;;  %p166_p8 = scmp.lt.s32.totalorder %s2710_s18, 3 }
   0xc   : > { %p167_p9 = pnand %p2315_p7, %p166_p8 }
   0xd   : > { %s2317_s5 = sshll.u32 (!%p167_p9), %s2768_s19, 3  ;;  %s2714_s27 = smov (!%p167_p9), 32  }
   0xe   : > { %170 = sbr.rel (%p167_p9) target bundleno = 1398 (0x576), region = 36  ;;  %p193_p10 = scmp.lt.s32.totalorder (!%p167_p9), %s2317_s5, 15 }
   0xf   : > { %s2715_s28 = smov (!%p167_p9), 16   ;;  %s2716_s29 = smov (!%p167_p9), 48  }
  0x10   : > { %s2717_s30 = smov (!%p167_p9), 64   ;;  %s2720_s7 = smov (!%p167_p9), 112  }
  0x11   : > { %s189_s8 = sand.u32 (!%p167_p9), 1, %s2702_s16   ;;  %s2364_s10 = sshll.u32 (!%p167_p9), %s2768_s19, 8 }
  0x12   : > { %s3068_s20 = scalar_lea.hbm (!%p167_p9), %s3115_s4, %s2364_s10  ;;  %s2239_s19 = scalar_lea.sflag (!%p167_p9), [#allocation3], %s189_s8 }
  0x13   : > { %v207_v0 = vld [vmem:[%s3112_s1 + $0x8] sm:$0xff]  ;;  %v206_v1 = vld [vmem:[%s3112_s1] sm:$0xff]  ;;  %s3123_s5 = smov (!%p193_p10, %s2317_s5), 15  ;;  %vm212_vm0 = vcmask 130048   ;;  %vm598_vm1 = vcmask 64512   ;;  %vm2217_vm2 = vcmask 261120  }
  0x14   : > { %2417 = vmatprep.subr.mxu0 %v207_v0  ;;  %s2318_s6 = sshll.u32 %s3123_s5, 3  ;;  %v209_v34 = vld [vmem:[%s3113_s2 + $0x8] sm:$0xff]  ;;  %v208_v35 = vld [vmem:[%s3113_s2] sm:$0xff]  ;;  %s2718_s5 = smov 80   ;;  %vm2219_vm3 = vcmask 392192   ;;  %vm2221_vm4 = vcmask 523264  }
  0x15   : > { %2418 = vmatpush3.msra.mxu0 %v207_v0  ;;  %s196_s9 = scalar_lea.vmem %s3111_s0, %s2318_s6  ;;  %v210_v39 = vld [vmem:[%s3114_s3] sm:$0xff]  ;;  %v211_v40 = vld [vmem:[%s3114_s3 + $0x8] sm:$0xff]  ;;  %s2719_s6 = smov 96   ;;  %vm2223_vm5 = vcmask 654336   ;;  %vm2225_vm6 = vcmask 785408   ;;  %vm2227_vm7 = vcmask 916480  }
  0x16   : > { %2419 = vmatprep.subr.mxu0 %v206_v1  ;;  %v198_v2 = vld [vmem:[%s196_s9] sm:$0xff]  ;;  %v199_v3 = vld [vmem:[%s196_s9 + $0x8] sm:$0xff]  ;;  %v200_v4 = vld [vmem:[%s196_s9 + $0x10] sm:$0xff]  ;;  %s2721_s23 = smov [#allocation2]  }
  0x17   : > { %2420 = vmatpush3.msra.mxu0 %v206_v1  ;;  %2421 = vmatprep.mubr.msk.f32.mxu0 %vm212_vm0, %v198_v2  ;;  %v201_v5 = vld [vmem:[%s196_s9 + $0x18] sm:$0xff]  ;;  %v203_v6 = vld [vmem:[%s196_s9 + $0x28] sm:$0xff]  ;;  %v202_v7 = vld [vmem:[%s196_s9 + $0x20] sm:$0xff] }
  0x18   : > { %2433 = vmatprep.subr.mxu0 %v198_v2  ;;  %2422 = vmatmul.mubr.msk.f32.vlgmr.msra.gmra.mxu0 %vm212_vm0, %v199_v3  ;;  %v204_v8 = vld [vmem:[%s196_s9 + $0x30] sm:$0xff]  ;;  %v205_v9 = vld [vmem:[%s196_s9 + $0x38] sm:$0xff]  ;;  %s2316_s9 = sshll.u32 %s189_s8, 4 }
  0x19   : > { %2438 = vmatprep.subr.mxu1 %v199_v3  ;;  %2424 = vmatprep.mubr.msk.f32.mxu0 %vm212_vm0, %v200_v4  ;;  %s191_s11 = scalar_lea.vmem [#allocation2], %s2316_s9 }
  0x1a   : > { %2434 = vmatpush3.msra.mxu0 %v198_v2  ;;  %2439 = vmatpush3.msra.mxu1 %v199_v3  ;;  %s2253_s12 = sshll.u32 %s191_s11, 4  ;;  %s3070_s12 = int_to_ptr.vmem [resolvable:$true] %s2253_s12 }
  0x1b   : > { %2458 = vmatprep.subr.mxu0 %v203_v6  ;;  %2443 = vmatprep.subr.mxu1 %v200_v4  ;;  %s2650_s22 = scalar_lea.vmem %s3070_s12, 256 }
  0x1c   : > { %2425 = vmatmul.mubr.msk.f32.gmra.mxu0 %vm212_vm0, %v201_v5  ;;  %p2651_p11 = scmp.ne.s32.totalorder %s3070_s12, %s2650_s22 }
  0x1d   : > { %2427 = vmatprep.mubr.msk.f32.mxu0 %vm212_vm0, %v202_v7 }
  0x1e   : > { %p2652_p12 = pnand %p2651_p11, %p2785_p5 }
  0x20   : > { %2428 = vmatmul.mubr.msk.f32.gmra.mxu0 %vm212_vm0, %v203_v6  ;;  %p2653_p13 = pneg %p2652_p12 }
  0x21   : > { %2430 = vmatprep.mubr.msk.f32.mxu0 %vm212_vm0, %v204_v8 }
  0x24   : > { %2431 = vmatmul.mubr.msk.f32.gmra.mxu0 %vm212_vm0, %v205_v9 }
  0xd8   : > { %v2423_v10 = vpop.f32.mrf.mxu0 }
  0xd9   : > { %374 = vxpose.xlu0.b32.start.end [1/1] (short) (narrow) %v2423_v10, 16 }
  0xda   : > { %v303_v11 = vpop.f32.mrf.mxu0 }
  0xdc   : > { %v2426_v12 = vpop.f32.mrf.mxu0 }
  0xdd   : > { %438 = vxpose.xlu1.b32.start.end [1/1] (short) (narrow) %v2426_v12, 16 }
  0xde   : > { %v313_v13 = vpop.f32.mrf.mxu0 }
  0xdf   : > { %406 = vxpose.xlu0.b32.start.end [1/1] (short) (narrow) %v313_v13, 16 }
  0xe0   : > { %v2429_v14 = vpop.f32.mrf.mxu0 }
  0xe2   : > { %342 = vxpose.xlu1.b32.start.end [1/1] (short) (narrow) %v303_v11, 16  ;;  %v323_v15 = vpop.f32.mrf.mxu0 }
  0xe4   : > { %470 = vxpose.xlu0.b32.start.end [1/1] (short) (narrow) %v323_v15, 16  ;;  %v2432_v16 = vpop.f32.mrf.mxu0 }
  0xe6   : > { %v333_v17 = vpop.f32.mrf.mxu0 }
  0xe7   : > { %502 = vxpose.xlu1.b32.start.end [1/1] (short) (narrow) %v2429_v14, 16 }
  0xe9   : > { %534 = vxpose.xlu0.b32.start.end [1/1] (short) (narrow) %v333_v17, 16 }
  0xec   : > { %566 = vxpose.xlu1.b32.start.end [1/1] (short) (narrow) %v2432_v16, 16 }
 0x155   : > { %v390_v18 = vpop.trf.xlu0 }
 0x156   : > { %2440 = vmatprep.mubr.msk.f32.mxu1 %vm598_vm1, %v390_v18 }
 0x159   : > { %v391_v19 = vpop.trf.xlu0  ;;  %v454_v20 = vpop.trf.xlu1 }
 0x15a   : > { %2441 = vmatmul.mubr.msk.f32.vlgmr.msra.gmra.mxu1 %vm598_vm1, %v391_v19 }
 0x15b   : > { %2444 = vmatpush3.msra.mxu1 %v200_v4 }
 0x15c   : > { %2448 = vmatprep.subr.mxu1 %v201_v5 }
 0x15d   : > { %v455_v21 = vpop.trf.xlu1  ;;  %v422_v22 = vpop.trf.xlu0 }
 0x15e   : > { %2445 = vmatprep.mubr.msk.f32.mxu1 %vm598_vm1, %v422_v22 }
 0x161   : > { %v358_v23 = vpop.trf.xlu1  ;;  %v423_v24 = vpop.trf.xlu0 }
 0x162   : > { %2435 = vmatprep.mubr.msk.f32.mxu0 %vm598_vm1, %v358_v23  ;;  %2446 = vmatmul.mubr.msk.f32.vlgmr.msra.gmra.mxu1 %vm598_vm1, %v423_v24 }
 0x163   : > { %2450 = vmatprep.mubr.msk.f32.mxu1 %vm598_vm1, %v454_v20  ;;  %2449 = vmatpush3.msra.mxu1 %v201_v5 }
 0x164   : > { %2453 = vmatprep.subr.mxu1 %v202_v7 }
 0x165   : > { %v359_v25 = vpop.trf.xlu1  ;;  %v486_v26 = vpop.trf.xlu0 }
 0x166   : > { %2436 = vmatmul.mubr.msk.f32.vlgmr.msra.gmra.mxu0 %vm598_vm1, %v359_v25  ;;  %2451 = vmatmul.mubr.msk.f32.vlgmr.msra.gmra.mxu1 %vm598_vm1, %v455_v21 }
 0x167   : > { %2454 = vmatpush3.msra.mxu1 %v202_v7  ;;  %2455 = vmatprep.mubr.msk.f32.mxu1 %vm598_vm1, %v486_v26 }
 0x168   : > { %2459 = vmatpush3.msra.mxu0 %v203_v6  ;;  %2463 = vmatprep.subr.mxu1 %v204_v8 }
 0x169   : > { %v518_v27 = vpop.trf.xlu1  ;;  %v487_v28 = vpop.trf.xlu0  ;;  %2468 = vmatprep.subr.mxu0 %v205_v9 }
 0x16a   : > { %2456 = vmatmul.mubr.msk.f32.vlgmr.msra.gmra.mxu1 %vm598_vm1, %v487_v28  ;;  %2460 = vmatprep.mubr.msk.f32.mxu0 %vm598_vm1, %v518_v27 }
 0x16b   : > { %2464 = vmatpush3.msra.mxu1 %v204_v8 }
 0x16c   : > { %2501 = vmatprep.subr.mxu1 %v209_v34 }
 0x16d   : > { %v519_v29 = vpop.trf.xlu1  ;;  %v550_v30 = vpop.trf.xlu0 }
 0x16e   : > { %2461 = vmatmul.mubr.msk.f32.vlgmr.msra.gmra.mxu0 %vm598_vm1, %v519_v29  ;;  %2465 = vmatprep.mubr.msk.f32.mxu1 %vm598_vm1, %v550_v30 }
 0x16f   : > { %2469 = vmatpush3.msra.mxu0 %v205_v9 }
 0x170   : > { %2473 = vmatprep.subr.mxu0 %v209_v34 }
 0x171   : > { %v582_v31 = vpop.trf.xlu1  ;;  %v551_v32 = vpop.trf.xlu0 }
 0x172   : > { %2466 = vmatmul.mubr.msk.f32.vlgmr.msra.gmra.mxu1 %vm598_vm1, %v551_v32  ;;  %2470 = vmatprep.mubr.msk.f32.mxu0 %vm598_vm1, %v582_v31 }
 0x173   : > { %2503 = vmatpush3.msra.mxu1 %v209_v34 }
 0x174   : > { %2502 = vmatprep.subr.mxu1 %v208_v35 }
 0x175   : > { %v583_v33 = vpop.trf.xlu1  ;;  %2504 = vmatpush3.msra.mxu1 %v208_v35 }
 0x176   : > { %2471 = vmatmul.mubr.msk.f32.vlgmr.msra.gmra.mxu0 %vm598_vm1, %v583_v33 }
 0x177   : > { %2474 = vmatpush3.msra.mxu0 %v209_v34 }
 0x178   : > { %2475 = vmatprep.subr.mxu0 %v208_v35 }
 0x179   : > { %2476 = vmatpush3.msra.mxu0 %v208_v35 }
 0x21a   : > { %v2442_v36 = vpop.f32.mrf.mxu1 }
 0x21b   : > { %v758_v54 = vadd.f32 %v2442_v36, %v211_v40 }
 0x21c   : > { %v752_v37 = vpop.f32.mrf.mxu1 }
 0x21d   : > { %v753_v41 = vadd.f32 %v752_v37, %v210_v39 }
 0x21f   : > { %2554 = vtanh.f32 %v753_v41 }
 0x222   : > { %v2447_v38 = vpop.f32.mrf.mxu1 }
 0x223   : > { %v839_v56 = vadd.f32 %v2447_v38, %v211_v40 }
 0x224   : > { %v833_v42 = vpop.f32.mrf.mxu1 }
 0x225   : > { %v834_v43 = vadd.f32 %v833_v42, %v210_v39 }
 0x226   : > { %v2437_v44 = vpop.f32.mrf.mxu0  ;;  %v2452_v45 = vpop.f32.mrf.mxu1 }
 0x227   : > { %v677_v46 = vadd.f32 %v2437_v44, %v211_v40  ;;  %2556 = vtanh.f32 %v834_v43  ;;  %v920_v49 = vadd.f32 %v2452_v45, %v211_v40 }
 0x228   : > { %v671_v47 = vpop.f32.mrf.mxu0  ;;  %v914_v48 = vpop.f32.mrf.mxu1 }
 0x229   : > { %v672_v50 = vadd.f32 %v671_v47, %v210_v39  ;;  %v915_v51 = vadd.f32 %v914_v48, %v210_v39  ;;  %2558 = vtanh.f32 %v677_v46 }
 0x22a   : > { %v2457_v52 = vpop.f32.mrf.mxu1 }
 0x22b   : > { %2560 = vtanh.f32 %v672_v50  ;;  %v1001_v53 = vadd.f32 %v2457_v52, %v211_v40 }
 0x22c   : > { %2562 = vtanh.f32 %v915_v51  ;;  %v995_v55 = vpop.f32.mrf.mxu1  ;;  %v2555_v1 = vpop.eup %2554 }
 0x22d   : > { %2564 = vtanh.f32 %v920_v49  ;;  %v996_v57 = vadd.f32 %v995_v55, %v210_v39 }
 0x22e   : > { %2566 = vtanh.f32 %v1001_v53  ;;  %v2462_v58 = vpop.f32.mrf.mxu0 }
 0x22f   : > { %2568 = vtanh.f32 %v996_v57  ;;  %v1082_v59 = vadd.f32 %v2462_v58, %v211_v40 }
 0x230   : > { %2570 = vtanh.f32 %v758_v54  ;;  %v1076_v60 = vpop.f32.mrf.mxu0 }
 0x231   : > { %2572 = vtanh.f32 %v839_v56  ;;  %v1077_v61 = vadd.f32 %v1076_v60, %v210_v39 }
 0x232   : > { %2574 = vtanh.f32 %v1082_v59  ;;  %v2467_v62 = vpop.f32.mrf.mxu1 }
 0x233   : > { %2576 = vtanh.f32 %v1077_v61  ;;  %v1163_v63 = vadd.f32 %v2467_v62, %v211_v40 }
 0x234   : > { %v1157_v0 = vpop.f32.mrf.mxu1  ;;  %v2557_v3 = vpop.eup %2556 }
 0x235   : > { %v1158_v2 = vadd.f32 %v1157_v0, %v210_v39  ;;  %2578 = vtanh.f32 %v1163_v63 }
 0x236   : > { %v2472_v4 = vpop.f32.mrf.mxu0  ;;  %v2559_v5 = vpop.eup %2558 }
 0x237   : > { %2580 = vtanh.f32 %v1158_v2  ;;  %v1244_v6 = vadd.f32 %v2472_v4, %v211_v40 }
 0x238   : > { %v2561_v7 = vpop.eup %2560  ;;  %v1238_v8 = vpop.f32.mrf.mxu0 }
 0x239   : > { %v2563_v9 = vpop.eup %2562  ;;  %2477 = vmatprep.mubr.msk.f32.mxu0 %vm212_vm0, %v2561_v7  ;;  %v1239_v10 = vadd.f32 %v1238_v8, %v210_v39  ;;  %2582 = vtanh.f32 %v1244_v6 }
 0x23a   : > { %v2565_v11 = vpop.eup %2564  ;;  %2486 = vmatprep.mubr.msk.f32.mxu1 %vm212_vm0, %v2563_v9  ;;  %2478 = vmatmul.mubr.msk.f32.vlgmr.msra.gmra.mxu0 %vm212_vm0, %v2559_v5 }
 0x23b   : > { %v2567_v12 = vpop.eup %2566  ;;  %2487 = vmatmul.mubr.msk.f32.vlgmr.msra.gmra.mxu1 %vm212_vm0, %v2565_v11  ;;  %2480 = vmatprep.mubr.msk.f32.mxu0 %vm212_vm0, %v2555_v1  ;;  %2584 = vtanh.f32 %v1239_v10 }
 0x23c   : > { %v2569_v13 = vpop.eup %2568 }
 0x23d   : > { %v2571_v14 = vpop.eup %2570  ;;  %2489 = vmatprep.mubr.msk.f32.mxu1 %vm212_vm0, %v2569_v13 }
 0x23e   : > { %v2573_v15 = vpop.eup %2572  ;;  %2481 = vmatmul.mubr.msk.f32.gmra.mxu0 %vm212_vm0, %v2571_v14 }
 0x23f   : > { %v2575_v16 = vpop.eup %2574  ;;  %2483 = vmatprep.mubr.msk.f32.mxu0 %vm212_vm0, %v2557_v3  ;;  %2490 = vmatmul.mubr.msk.f32.gmra.mxu1 %vm212_vm0, %v2567_v12 }
 0x240   : > { %v2577_v17 = vpop.eup %2576 }
 0x241   : > { %2492 = vmatprep.mubr.msk.f32.mxu1 %vm212_vm0, %v2577_v17 }
 0x242   : > { %2484 = vmatmul.mubr.msk.f32.gmra.mxu0 %vm212_vm0, %v2573_v15  ;;  %v2579_v18 = vpop.eup %2578 }
 0x243   : > { %2493 = vmatmul.mubr.msk.f32.gmra.mxu1 %vm212_vm0, %v2575_v16 }
 0x244   : > { %v2581_v19 = vpop.eup %2580 }
 0x245   : > { %2495 = vmatprep.mubr.msk.f32.mxu1 %vm212_vm0, %v2581_v19 }
 0x246   : > { %v2583_v20 = vpop.eup %2582 }
 0x247   : > { %2496 = vmatmul.mubr.msk.f32.gmra.mxu1 %vm212_vm0, %v2579_v18 }
 0x248   : > { %v2585_v21 = vpop.eup %2584 }
 0x249   : > { %2498 = vmatprep.mubr.msk.f32.mxu1 %vm212_vm0, %v2585_v21 }
 0x24b   : > { %2499 = vmatmul.mubr.msk.f32.gmra.mxu1 %vm212_vm0, %v2583_v20 }
 0x2fa   : > { %v2479_v22 = vpop.f32.mrf.mxu0 }
 0x2fb   : > { %v2488_v23 = vpop.f32.mrf.mxu1 }
 0x2fc   : > { %v1377_v24 = vpop.f32.mrf.mxu0 }
 0x2fd   : > { %v1407_v25 = vpop.f32.mrf.mxu1  ;;  %1456 = vxpose.xlu0.b32.start [1/2] (short) (narrow) %v1377_v24, 16 }
 0x2fe   : > { %v2482_v26 = vpop.f32.mrf.mxu0 }
 0x2ff   : > { %v2491_v27 = vpop.f32.mrf.mxu1 }
 0x300   : > { %v1387_v28 = vpop.f32.mrf.mxu0 }
 0x301   : > { %1457 = vxpose.xlu0.b32.end [2/2] (short) (narrow) %v2479_v22, 16  ;;  %1488 = vxpose.xlu1.b32.start [1/2] (short) (narrow) %v1387_v28, 16  ;;  %v1417_v29 = vpop.f32.mrf.mxu1 }
 0x302   : > { %v2485_v30 = vpop.f32.mrf.mxu0 }
 0x303   : > { %v2494_v31 = vpop.f32.mrf.mxu1 }
 0x304   : > { %v1397_v32 = vpop.f32.mrf.mxu0 }
 0x305   : > { %1489 = vxpose.xlu1.b32.end [2/2] (short) (narrow) %v2482_v26, 16  ;;  %1520 = vxpose.xlu0.b32.start [1/2] (short) (narrow) %v1397_v32, 16  ;;  %v1427_v33 = vpop.f32.mrf.mxu1 }
 0x307   : > { %v2497_v34 = vpop.f32.mrf.mxu1 }
 0x309   : > { %1552 = vxpose.xlu1.b32.start [1/2] (short) (narrow) %v1407_v25, 16  ;;  %1521 = vxpose.xlu0.b32.end [2/2] (short) (narrow) %v2485_v30, 16  ;;  %v1437_v35 = vpop.f32.mrf.mxu1 }
 0x30b   : > { %v2500_v36 = vpop.f32.mrf.mxu1 }
 0x30d   : > { %1553 = vxpose.xlu1.b32.end [2/2] (short) (narrow) %v2488_v23, 16  ;;  %1584 = vxpose.xlu0.b32.start [1/2] (short) (narrow) %v1417_v29, 16  ;;  %v1447_v37 = vpop.f32.mrf.mxu1 }
 0x311   : > { %1616 = vxpose.xlu1.b32.start [1/2] (short) (narrow) %v1427_v33, 16  ;;  %1585 = vxpose.xlu0.b32.end [2/2] (short) (narrow) %v2491_v27, 16 }
 0x315   : > { %1617 = vxpose.xlu1.b32.end [2/2] (short) (narrow) %v2494_v31, 16  ;;  %1648 = vxpose.xlu0.b32.start [1/2] (short) (narrow) %v1437_v35, 16 }
 0x319   : > { %1680 = vxpose.xlu1.b32.start [1/2] (short) (narrow) %v1447_v37, 16  ;;  %1649 = vxpose.xlu0.b32.end [2/2] (short) (narrow) %v2497_v34, 16 }
 0x31d   : > { %1681 = vxpose.xlu1.b32.end [2/2] (short) (narrow) %v2500_v36, 16 }
 0x379   : > { %v1472_v38 = vpop.trf.xlu0 }
 0x37a   : > { %v1712_v39 = vsel %vm212_vm0, %v1472_v38, -inf }
 0x37b   : > { %1713 = vmax.xlane.f32.xlu0 %v1712_v39 }
 0x37d   : > { %v1473_v40 = vpop.trf.xlu0  ;;  %v1504_v41 = vpop.trf.xlu1 }
 0x37e   : > { %v1715_v42 = vsel %vm212_vm0, %v1473_v40, -inf  ;;  %v1718_v43 = vsel %vm212_vm0, %v1504_v41, -inf }
 0x37f   : > { %1716 = vmax.xlane.f32.xlu1 %v1715_v42 }
 0x381   : > { %v1505_v44 = vpop.trf.xlu1  ;;  %v1536_v45 = vpop.trf.xlu0 }
 0x382   : > { %v1724_v46 = vsel %vm212_vm0, %v1536_v45, -inf  ;;  %v1721_v47 = vsel %vm212_vm0, %v1505_v44, -inf }
 0x383   : > { %1719 = vmax.xlane.f32.xlu1 %v1718_v43  ;;  %1725 = vmax.xlane.f32.xlu0 %v1724_v46 }
 0x385   : > { %v1568_v48 = vpop.trf.xlu1  ;;  %v1537_v49 = vpop.trf.xlu0 }
 0x386   : > { %v1730_v50 = vsel %vm212_vm0, %v1568_v48, -inf  ;;  %v1727_v51 = vsel %vm212_vm0, %v1537_v49, -inf }
 0x387   : > { %1722 = vmax.xlane.f32.xlu1 %v1721_v47  ;;  %1731 = vmax.xlane.f32.xlu0 %v1730_v50 }
 0x389   : > { %v2864_v52 = vpop.trf.xlu1  ;;  %v1600_v53 = vpop.trf.xlu0 }
 0x38a   : > { %v1736_v54 = vsel %vm212_vm0, %v1600_v53, -inf  ;;  %v1733_v55 = vsel %vm212_vm0, %v2864_v52, -inf }
 0x38b   : > { %1728 = vmax.xlane.f32.xlu1 %v1727_v51  ;;  %1737 = vmax.xlane.f32.xlu0 %v1736_v54 }
 0x38d   : > { %v2869_v56 = vpop.trf.xlu1  ;;  %v2871_v57 = vpop.trf.xlu0 }
 0x38e   : > { %v1742_v58 = vsel %vm212_vm0, %v2869_v56, -inf  ;;  %v1739_v59 = vsel %vm212_vm0, %v2871_v57, -inf }
 0x38f   : > { %1734 = vmax.xlane.f32.xlu1 %v1733_v55  ;;  %1743 = vmax.xlane.f32.xlu0 %v1742_v58 }
 0x391   : > { %v2877_v60 = vpop.trf.xlu1  ;;  %v2879_v61 = vpop.trf.xlu0 }
 0x392   : > { %v1748_v62 = vsel %vm212_vm0, %v2879_v61, -inf  ;;  %v1745_v63 = vsel %vm212_vm0, %v2877_v60, -inf }
 0x393   : > { %1740 = vmax.xlane.f32.xlu1 %v1739_v59  ;;  %1749 = vmax.xlane.f32.xlu0 %v1748_v62 }
 0x395   : > { %v2885_v0 = vpop.trf.xlu1  ;;  %v2887_v1 = vpop.trf.xlu0 }
 0x396   : > { %v1754_v2 = vsel %vm212_vm0, %v2885_v0, -inf  ;;  %v1751_v3 = vsel %vm212_vm0, %v2887_v1, -inf }
 0x397   : > { %1746 = vmax.xlane.f32.xlu1 %v1745_v63  ;;  %1755 = vmax.xlane.f32.xlu0 %v1754_v2 }
 0x399   : > { %v2893_v4 = vpop.trf.xlu1 }
 0x39a   : > { %v1757_v5 = vsel %vm212_vm0, %v2893_v4, -inf }
 0x39b   : > { %1752 = vmax.xlane.f32.xlu1 %v1751_v3 }
 0x39f   : > { %1758 = vmax.xlane.f32.xlu1 %v1757_v5 }
 0x404   : > { %v1714_v6 = vpop.xlane.xlu0 %1713 }
 0x405   : > { %v1760_v7 = vsub.f32 %v1472_v38, %v1714_v6 }
 0x407   : > { %v1776_v8 = vmul.f32 1.442695, %v1760_v7 }
 0x408   : > { %v1717_v9 = vpop.xlane.xlu1 %1716 }
 0x409   : > { %2586 = vpow2.f32 %v1776_v8  ;;  %v1761_v10 = vsub.f32 %v1473_v40, %v1717_v9 }
 0x40b   : > { %v1778_v11 = vmul.f32 1.442695, %v1761_v10 }
 0x40c   : > { %v1720_v12 = vpop.xlane.xlu1 %1719  ;;  %v1726_v13 = vpop.xlane.xlu0 %1725 }
 0x40d   : > { %2588 = vpow2.f32 %v1778_v11  ;;  %v1762_v14 = vsub.f32 %v1504_v41, %v1720_v12  ;;  %v1764_v15 = vsub.f32 %v1536_v45, %v1726_v13 }
 0x40f   : > { %v1780_v16 = vmul.f32 1.442695, %v1762_v14  ;;  %v1784_v17 = vmul.f32 1.442695, %v1764_v15 }
 0x410   : > { %v1723_v18 = vpop.xlane.xlu1 %1722  ;;  %v1732_v19 = vpop.xlane.xlu0 %1731 }
 0x411   : > { %2590 = vpow2.f32 %v1780_v16  ;;  %v1763_v20 = vsub.f32 %v1505_v44, %v1723_v18  ;;  %v1766_v21 = vsub.f32 %v1568_v48, %v1732_v19 }
 0x412   : > { %2592 = vpow2.f32 %v1784_v17 }
 0x413   : > { %v1782_v22 = vmul.f32 1.442695, %v1763_v20  ;;  %v1788_v23 = vmul.f32 1.442695, %v1766_v21 }
 0x414   : > { %v1729_v24 = vpop.xlane.xlu1 %1728  ;;  %v1738_v25 = vpop.xlane.xlu0 %1737 }
 0x415   : > { %2594 = vpow2.f32 %v1782_v22  ;;  %v1765_v26 = vsub.f32 %v1537_v49, %v1729_v24  ;;  %v1768_v27 = vsub.f32 %v1600_v53, %v1738_v25 }
 0x416   : > { %v2897_v28 = vpop.eup %2586  ;;  %2596 = vpow2.f32 %v1788_v23 }
 0x417   : > { %v1786_v29 = vmul.f32 1.442695, %v1765_v26  ;;  %v1792_v30 = vmul.f32 1.442695, %v1768_v27  ;;  %v1808_v31 = vsel %vm212_vm0, %v2897_v28, 0.0 }
 0x418   : > { %v1735_v32 = vpop.xlane.xlu1 %1734  ;;  %1809 = vadd.xlane.f32.xlu0 %v1808_v31  ;;  %v1744_v33 = vpop.xlane.xlu0 %1743 }
 0x419   : > { %2598 = vpow2.f32 %v1786_v29  ;;  %v1767_v34 = vsub.f32 %v2864_v52, %v1735_v32  ;;  %v1770_v35 = vsub.f32 %v2869_v56, %v1744_v33 }
 0x41a   : > { %v2903_v36 = vpop.eup %2588  ;;  %2600 = vpow2.f32 %v1792_v30 }
 0x41b   : > { %v1790_v37 = vmul.f32 1.442695, %v1767_v34  ;;  %v1796_v38 = vmul.f32 1.442695, %v1770_v35  ;;  %v1811_v39 = vsel %vm212_vm0, %v2903_v36, 0.0 }
 0x41c   : > { %v1741_v40 = vpop.xlane.xlu1 %1740  ;;  %1812 = vadd.xlane.f32.xlu1 %v1811_v39  ;;  %v1750_v41 = vpop.xlane.xlu0 %1749 }
 0x41d   : > { %2602 = vpow2.f32 %v1790_v37  ;;  %v1769_v42 = vsub.f32 %v2871_v57, %v1741_v40  ;;  %v1772_v43 = vsub.f32 %v2879_v61, %v1750_v41  ;;  %v2712_v41 = vmov 1983009808  }
 0x41e   : > { %v2909_v44 = vpop.eup %2590  ;;  %2604 = vpow2.f32 %v1796_v38 }
 0x41f   : > { %v2911_v45 = vpop.eup %2592  ;;  %v1794_v46 = vmul.f32 1.442695, %v1769_v42  ;;  %v1800_v47 = vmul.f32 1.442695, %v1772_v43  ;;  %v1814_v48 = vsel %vm212_vm0, %v2909_v44, 0.0  ;;  %v1891_v42 = vunpack.c.l.s4 %v2712_v41 }
 0x420   : > { %v1747_v49 = vpop.xlane.xlu1 %1746  ;;  %1815 = vadd.xlane.f32.xlu0 %v1814_v48  ;;  %v1756_v50 = vpop.xlane.xlu0 %1755  ;;  %v1820_v54 = vsel %vm212_vm0, %v2911_v45, 0.0  ;;  %v1893_v43 = vlaneseq }
 0x421   : > { %2606 = vpow2.f32 %v1794_v46  ;;  %v1771_v51 = vsub.f32 %v2877_v60, %v1747_v49  ;;  %v1774_v52 = vsub.f32 %v2885_v0, %v1756_v50 }
 0x422   : > { %v2917_v53 = vpop.eup %2594  ;;  %2608 = vpow2.f32 %v1800_v47 }
 0x423   : > { %v1798_v55 = vmul.f32 1.442695, %v1771_v51  ;;  %v1804_v56 = vmul.f32 1.442695, %v1774_v52  ;;  %v1817_v57 = vsel %vm212_vm0, %v2917_v53, 0.0  ;;  %v2923_v58 = vpop.eup %2596 }
 0x424   : > { %1818 = vadd.xlane.f32.xlu1 %v1817_v57  ;;  %v1753_v59 = vpop.xlane.xlu1 %1752  ;;  %1821 = vadd.xlane.f32.xlu0 %v1820_v54  ;;  %v1826_v0 = vsel %vm212_vm0, %v2923_v58, 0.0 }
 0x425   : > { %2610 = vpow2.f32 %v1798_v55  ;;  %v1773_v60 = vsub.f32 %v2887_v1, %v1753_v59  ;;  %v1892_v55 = vunpack.c.0.s8 %v1891_v42 }
 0x426   : > { %v2926_v61 = vpop.eup %2598  ;;  %2612 = vpow2.f32 %v1804_v56  ;;  %v1894_v56 = vshrl.u32 %v1893_v43, 7 }
 0x427   : > { %v1802_v62 = vmul.f32 1.442695, %v1773_v60  ;;  %v1823_v63 = vsel %vm212_vm0, %v2926_v61, 0.0  ;;  %v2932_v2 = vpop.eup %2600 }
 0x428   : > { %1824 = vadd.xlane.f32.xlu1 %v1823_v63  ;;  %v1759_v3 = vpop.xlane.xlu1 %1758  ;;  %1827 = vadd.xlane.f32.xlu0 %v1826_v0  ;;  %v1832_v8 = vsel %vm212_vm0, %v2932_v2, 0.0  ;;  %v2713_v63 = vmov 1934713408  }
 0x429   : > { %2614 = vpow2.f32 %v1802_v62  ;;  %v1775_v5 = vsub.f32 %v2893_v4, %v1759_v3  ;;  %v1955_v0 = vunpack.c.l.s4 %v2713_v63 }
 0x42a   : > { %v2935_v6 = vpop.eup %2602 }
 0x42b   : > { %v1806_v1 = vmul.f32 1.442695, %v1775_v5  ;;  %v1829_v7 = vsel %vm212_vm0, %v2935_v6, 0.0  ;;  %v2941_v9 = vpop.eup %2604 }
 0x42c   : > { %1830 = vadd.xlane.f32.xlu1 %v1829_v7  ;;  %1833 = vadd.xlane.f32.xlu0 %v1832_v8  ;;  %v1838_v4 = vsel %vm212_vm0, %v2941_v9, 0.0  ;;  %v2973_v7 = vsub.s32 %v1892_v55, %v1894_v56 }
 0x42d   : > { %2616 = vpow2.f32 %v1806_v1 }
 0x42e   : > { %v2943_v10 = vpop.eup %2606 }
 0x42f   : > { %v1835_v11 = vsel %vm212_vm0, %v2943_v10, 0.0  ;;  %v2949_v12 = vpop.eup %2608 }
 0x430   : > { %1836 = vadd.xlane.f32.xlu1 %v1835_v11  ;;  %1839 = vadd.xlane.f32.xlu0 %v1838_v4  ;;  %v1844_v15 = vsel %vm212_vm0, %v2949_v12, 0.0  ;;  %v1956_v4 = vunpack.c.0.s8 %v1955_v0 }
 0x432   : > { %v2951_v13 = vpop.eup %2610 }
 0x433   : > { %v1841_v14 = vsel %vm212_vm0, %v2951_v13, 0.0  ;;  %v2957_v16 = vpop.eup %2612 }
 0x434   : > { %1842 = vadd.xlane.f32.xlu1 %v1841_v14  ;;  %1845 = vadd.xlane.f32.xlu0 %v1844_v15  ;;  %v1850_v19 = vsel %vm212_vm0, %v2957_v16, 0.0 }
 0x436   : > { %v2959_v17 = vpop.eup %2614 }
 0x437   : > { %v1847_v18 = vsel %vm212_vm0, %v2959_v17, 0.0 }
 0x438   : > { %1848 = vadd.xlane.f32.xlu1 %v1847_v18  ;;  %1851 = vadd.xlane.f32.xlu0 %v1850_v19 }
 0x43a   : > { %v2965_v20 = vpop.eup %2616 }
 0x43b   : > { %v1853_v21 = vsel %vm212_vm0, %v2965_v20, 0.0 }
 0x43c   : > { %1854 = vadd.xlane.f32.xlu1 %v1853_v21 }
 0x4a1   : > { %v1810_v22 = vpop.xlane.xlu0 %1809 }
 0x4a5   : > { %v1813_v23 = vpop.xlane.xlu1 %1812 }
 0x4a9   : > { %v1816_v24 = vpop.xlane.xlu0 %1815 }
 0x4ad   : > { %v1819_v25 = vpop.xlane.xlu1 %1818  ;;  %v1822_v26 = vpop.xlane.xlu0 %1821 }
 0x4b1   : > { %v1825_v27 = vpop.xlane.xlu1 %1824  ;;  %v1828_v29 = vpop.xlane.xlu0 %1827 }
 0x4b2   : > { %2618 = vrcp.f32 %v1828_v29 }
 0x4b3   : > { %2620 = vrcp.f32 %v1816_v24 }
 0x4b4   : > { %2622 = vrcp.f32 %v1822_v26  ;;  %v2998_v26 = vsub.s32 %v1956_v4, %v1894_v56 }
 0x4b5   : > { %v1831_v30 = vpop.xlane.xlu1 %1830  ;;  %v1834_v31 = vpop.xlane.xlu0 %1833  ;;  %2624 = vrcp.f32 %v1810_v22 }
 0x4b6   : > { %2626 = vrcp.f32 %v1813_v23 }
 0x4b7   : > { %2628 = vrcp.f32 %v1819_v25 }
 0x4b8   : > { %2630 = vrcp.f32 %v1831_v30 }
 0x4b9   : > { %v1837_v32 = vpop.xlane.xlu1 %1836  ;;  %v1840_v33 = vpop.xlane.xlu0 %1839  ;;  %2632 = vrcp.f32 %v1825_v27 }
 0x4ba   : > { %2634 = vrcp.f32 %v1834_v31 }
 0x4bd   : > { %v1843_v34 = vpop.xlane.xlu1 %1842  ;;  %v1846_v35 = vpop.xlane.xlu0 %1845 }
 0x4be   : > { %2636 = vrcp.f32 %v1846_v35 }
 0x4bf   : > { %2638 = vrcp.f32 %v1837_v32  ;;  %v2619_v39 = vpop.eup %2618 }
 0x4c0   : > { %2640 = vrcp.f32 %v1840_v33  ;;  %v2621_v40 = vpop.eup %2620  ;;  %v1878_v49 = vmul.f32 %v2619_v39, %v2923_v58 }
 0x4c1   : > { %v1849_v37 = vpop.xlane.xlu1 %1848  ;;  %v1852_v38 = vpop.xlane.xlu0 %1851  ;;  %v1874_v52 = vmul.f32 %v2621_v40, %v2909_v44 }
 0x4c2   : > { %2642 = vrcp.f32 %v1849_v37  ;;  %v2623_v46 = vpop.eup %2622 }
 0x4c3   : > { %2644 = vrcp.f32 %v1852_v38  ;;  %v2625_v48 = vpop.eup %2624  ;;  %v1876_v54 = vmul.f32 %v2623_v46, %v2911_v45  ;;  %v1904_v62 = vcombine.low %v1874_v52, %v1878_v49  ;;  %v1905_v29 = vcombine.high %v1874_v52, %v1878_v49 }
 0x4c4   : > { %2646 = vrcp.f32 %v1843_v34  ;;  %v2627_v50 = vpop.eup %2626  ;;  %v1872_v60 = vmul.f32 %v2625_v48, %v2897_v28 }
 0x4c5   : > { %v1855_v47 = vpop.xlane.xlu1 %1854  ;;  %v2629_v51 = vpop.eup %2628  ;;  %v1912_v28 = vrot.slane %v1904_v62, %v2973_v7  ;;  %v2988_v19 = vmul.f32 %v2627_v50, %v2903_v36  ;;  %v3012_v42 = vrot.slane %v1905_v29, %v2973_v7 }
 0x4c6   : > { %2648 = vrcp.f32 %v1855_v47  ;;  %v2631_v57 = vpop.eup %2630  ;;  %v1888_v1 = vcombine.low %v1872_v60, %v1876_v54  ;;  %v2984_v14 = vmul.f32 %v2629_v51, %v2917_v53 }
 0x4c7   : > { %v2633_v59 = vpop.eup %2632  ;;  %v2976_v58 = vmul.f32 %v2631_v57, %v2935_v6  ;;  %v1889_v6 = vcombine.high %v1872_v60, %v1876_v54 }
 0x4c8   : > { %v2635_v3 = vpop.eup %2634  ;;  %v2980_v8 = vmul.f32 %v2633_v59, %v2926_v61 }
 0x4c9   : > { %v1880_v18 = vmul.f32 %v2635_v3, %v2932_v2  ;;  %v2040_v22 = vcombine.low %v2984_v14, %v2976_v58  ;;  %v3002_v32 = vrot.slane %v1889_v6, %v2973_v7 }
 0x4ca   : > { %v2024_v2 = vcombine.low %v2988_v19, %v2980_v8  ;;  %v2025_v59 = vcombine.high %v2988_v19, %v2980_v8 }
 0x4cb   : > { %v2637_v5 = vpop.eup %2636  ;;  %v2048_v34 = vrot.slane %v2040_v22, %v2973_v7 }
 0x4cc   : > { %v2639_v44 = vpop.eup %2638  ;;  %v1884_v45 = vmul.f32 %v2637_v5, %v2949_v12  ;;  %v1896_v12 = vrot.slane %v1888_v1, %v2973_v7  ;;  %v2039_v4 = vrot.slane %v2025_v59, %v2973_v7 }
 0x4cd   : > { %v2641_v11 = vpop.eup %2640  ;;  %v1881_v27 = vmul.f32 %v2639_v44, %v2943_v10  ;;  %v2032_v10 = vrot.slane %v2024_v2, %v2973_v7 }
 0x4ce   : > { %v1882_v24 = vmul.f32 %v2641_v11, %v2941_v9  ;;  %v1920_v25 = vcombine.low %v1880_v18, %v1884_v45  ;;  %v1953_v36 = vcombine.high %v1896_v12, %v1912_v28  ;;  %v1952_v31 = vcombine.low %v1896_v12, %v1912_v28 }
 0x4cf   : > { %v2643_v15 = vpop.eup %2642  ;;  %v1921_v39 = vcombine.high %v1880_v18, %v1884_v45  ;;  %v2089_v51 = vcombine.high %v2032_v10, %v2048_v34  ;;  %v2088_v60 = vcombine.low %v2032_v10, %v2048_v34  ;;  %v1968_v45 = vcombine.low %v3002_v32, %v3012_v42 }
 0x4d0   : > { %v2645_v21 = vpop.eup %2644  ;;  %v1885_v61 = vmul.f32 %v2643_v15, %v2959_v17  ;;  %v1928_v37 = vrot.slane %v1920_v25, %v2973_v7  ;;  %v1967_v40 = vrot.slane %v1953_v36, %v2998_v26  ;;  %v3018_v48 = vrot.slane %v1952_v31, %v2998_v26 }
 0x4d1   : > { %v2647_v23 = vpop.eup %2646  ;;  %v1886_v53 = vmul.f32 %v2645_v21, %v2957_v16  ;;  %v1935_v55 = vrot.slane %v1921_v39, %v2973_v7  ;;  %v2103_v1 = vrot.slane %v2089_v51, %v2998_v26  ;;  %v1976_v12 = vrot.slane %v1968_v45, %v2998_v26 }
 0x4d2   : > { %v1883_v9 = vmul.f32 %v2647_v23, %v2951_v13  ;;  %v2056_v35 = vcombine.low %v1881_v27, %v1885_v61  ;;  %v2041_v13 = vcombine.high %v2984_v14, %v2976_v58  ;;  %v2057_v56 = vcombine.high %v1881_v27, %v1885_v61 }
 0x4d3   : > { %v2649_v30 = vpop.eup %2648  ;;  %v1936_v17 = vcombine.low %v1882_v24, %v1886_v53  ;;  %v1937_v33 = vcombine.high %v1882_v24, %v1886_v53  ;;  %v2096_v14 = vrot.slane %v2088_v60, %v2998_v26  ;;  %v1969_v27 = vcombine.high %v3002_v32, %v3012_v42 }
 0x4d4   : > { %v1887_v16 = vmul.f32 %v2649_v30, %v2965_v20  ;;  %v2064_v49 = vrot.slane %v2056_v35, %v2973_v7  ;;  %v2055_v8 = vrot.slane %v2041_v13, %v2973_v7  ;;  %v2071_v11 = vrot.slane %v2057_v56, %v2973_v7 }
 0x4d5   : > { %v1944_v38 = vrot.slane %v1936_v17, %v2973_v7  ;;  %v1951_v46 = vrot.slane %v1937_v33, %v2973_v7 }
 0x4d6   : > { %v2072_v41 = vcombine.low %v1883_v9, %v1887_v16  ;;  %v2073_v47 = vcombine.high %v1883_v9, %v1887_v16  ;;  %v2104_v61 = vcombine.low %v2039_v4, %v2055_v8  ;;  %v2105_v29 = vcombine.high %v2039_v4, %v2055_v8 }
 0x4d7   : > { %v1985_v20 = vcombine.high %v1928_v37, %v1944_v38  ;;  %v1984_v43 = vcombine.low %v1928_v37, %v1944_v38  ;;  %v2000_v3 = vcombine.low %v1935_v55, %v1951_v46  ;;  %v2001_v2 = vcombine.high %v1935_v55, %v1951_v46 }
 0x4d8   : > { %v2080_v50 = vrot.slane %v2072_v41, %v2973_v7  ;;  %v2087_v5 = vrot.slane %v2073_v47, %v2973_v7  ;;  %v2112_v24 = vrot.slane %v2104_v61, %v2998_v26  ;;  %v1983_v9 = vrot.slane %v1969_v27, %v2998_v26 }
 0x4d9   : > { %v1999_v52 = vrot.slane %v1985_v20, %v2998_v26  ;;  %v3024_v54 = vrot.slane %v1984_v43, %v2998_v26  ;;  %v2008_v18 = vrot.slane %v2000_v3, %v2998_v26  ;;  %v2015_v31 = vrot.slane %v2001_v2, %v2998_v26 }
 0x4da   : > { %v2121_v57 = vcombine.high %v2064_v49, %v2080_v50  ;;  %v2120_v62 = vcombine.low %v2064_v49, %v2080_v50  ;;  %v2136_v19 = vcombine.low %v2071_v11, %v2087_v5  ;;  %v2137_v36 = vcombine.high %v2071_v11, %v2087_v5 }
 0x4db   : > { %v2018_v63 = vcombine.low %v1967_v40, %v1999_v52  ;;  %v2017_v0 = vcombine.high %v3018_v48, %v3024_v54  ;;  %v2019_v15 = vcombine.high %v1967_v40, %v1999_v52  ;;  %v2016_v6 = vcombine.low %v3018_v48, %v3024_v54 }
 0x4dc   : > { %v2135_v58 = vrot.slane %v2121_v57, %v2998_v26  ;;  %v3035_v44 = vrot.slane %v2120_v62, %v2998_v26  ;;  %v2020_v22 = vcombine.low %v1976_v12, %v2008_v18  ;;  %v2144_v7 = vrot.slane %v2136_v19, %v2998_v26 }
 0x4dd   : > { %2165 = vrot.lane.b32.xlu1 %v2018_v63, %s2714_s27  ;;  %2161 = vrot.lane.b32.xlu0 %v2017_v0, %s2715_s28  ;;  %v2021_v53 = vcombine.high %v1976_v12, %v2008_v18  ;;  %v2151_v33 = vrot.slane %v2137_v36, %v2998_v26  ;;  %v2119_v16 = vrot.slane %v2105_v29, %v2998_v26 }
 0x4de   : > { %v2154_v28 = vcombine.low %v2103_v1, %v2135_v58  ;;  %v2152_v21 = vcombine.low %v2096_v14, %v3035_v44  ;;  %v2155_v23 = vcombine.high %v2103_v1, %v2135_v58  ;;  %v2156_v25 = vcombine.low %v2112_v24, %v2144_v7 }
 0x4df   : > { %v2153_v30 = vcombine.high %v2096_v14, %v3035_v44  ;;  %v2157_v17 = vcombine.high %v2112_v24, %v2144_v7  ;;  %v2022_v34 = vcombine.low %v1983_v9, %v2015_v31  ;;  %v2158_v35 = vcombine.low %v2119_v16, %v2151_v33 }
 0x4e0   : > { %v2023_v32 = vcombine.high %v1983_v9, %v2015_v31  ;;  %v2159_v37 = vcombine.high %v2119_v16, %v2151_v33 }
 0x4e1   : > { %2169 = vrot.lane.b32.xlu1 %v2019_v15, %s2716_s29  ;;  %2193 = vrot.lane.b32.xlu0 %v2154_v28, %s2714_s27  ;;  %s2654_s27 = sshll.u32 %s2721_s23, 4  ;;  %s2655_s27 = int_to_ptr.vmem [resolvable:$false] %s2654_s27 }
 0x4e2   : > { %p2657_p0 = scmp.lt.s32.totalorder %s3070_s12, %s2655_s27 }
 0x4e5   : > { %2173 = vrot.lane.b32.xlu1 %v2020_v22, %s2717_s30  ;;  %2197 = vrot.lane.b32.xlu0 %v2155_v23, %s2716_s29 }
 0x4e9   : > { %2177 = vrot.lane.b32.xlu1 %v2021_v53, %s2718_s5  ;;  %2201 = vrot.lane.b32.xlu0 %v2156_v25, %s2717_s30 }
 0x4ed   : > { %2189 = vrot.lane.b32.xlu1 %v2153_v30, %s2715_s28  ;;  %2205 = vrot.lane.b32.xlu0 %v2157_v17, %s2718_s5  ;;  %s2656_s28 = scalar_lea.vmem %s2655_s27, 512 }
 0x4ee   : > { %p2658_p1 = scmp.lt.s32.totalorder %s2656_s28, %s2650_s22 }
 0x4f0   : > { %p2659_p2 = por %p2658_p1, %p2657_p0 }
 0x4f1   : > { %2181 = vrot.lane.b32.xlu1 %v2022_v34, %s2719_s6  ;;  %2209 = vrot.lane.b32.xlu0 %v2158_v35, %s2719_s6 }
 0x4f2   : > { %p2660_p3 = pnand %p2659_p2, %p2653_p13 }
 0x4f5   : > { %2185 = vrot.lane.b32.xlu1 %v2023_v32, %s2720_s7  ;;  %2213 = vrot.lane.b32.xlu0 %v2159_v37, %s2720_s7 }
 0x54f   : > { %v2166_v38 = vpop.permute.xlu1 %2165  ;;  %v2162_v10 = vpop.permute.xlu0 %2161 }
 0x550   : > { %v2216_v46 = vsel %vm212_vm0, %v2016_v6, %v2162_v10 }
 0x551   : > { %v2218_v50 = vsel %vm2217_vm2, %v2216_v46, %v2166_v38 }
 0x553   : > { %v2170_v39 = vpop.permute.xlu1 %2169  ;;  %v2194_v40 = vpop.permute.xlu0 %2193 }
 0x554   : > { %v2220_v55 = vsel %vm2219_vm3, %v2218_v50, %v2170_v39 }
 0x557   : > { %v2174_v41 = vpop.permute.xlu1 %2173  ;;  %v2198_v42 = vpop.permute.xlu0 %2197 }
 0x558   : > { %v2222_v57 = vsel %vm2221_vm4, %v2220_v55, %v2174_v41 }
 0x55b   : > { %v2178_v13 = vpop.permute.xlu1 %2177  ;;  %v2202_v26 = vpop.permute.xlu0 %2201 }
 0x55c   : > { %v2224_v59 = vsel %vm2223_vm5, %v2222_v57, %v2178_v13 }
 0x55f   : > { %v2190_v20 = vpop.permute.xlu1 %2189  ;;  %v2206_v43 = vpop.permute.xlu0 %2205 }
 0x560   : > { %v2229_v47 = vsel %vm212_vm0, %v2152_v21, %v2190_v20 }
 0x561   : > { %v2230_v48 = vsel %vm2217_vm2, %v2229_v47, %v2194_v40 }
 0x562   : > { %v2231_v49 = vsel %vm2219_vm3, %v2230_v48, %v2198_v42 }
 0x563   : > { %v2232_v51 = vsel %vm2221_vm4, %v2231_v49, %v2202_v26  ;;  %v2182_v52 = vpop.permute.xlu1 %2181  ;;  %v2210_v54 = vpop.permute.xlu0 %2209 }
 0x564   : > { %v2233_v56 = vsel %vm2223_vm5, %v2232_v51, %v2206_v43  ;;  %v2226_v60 = vsel %vm2225_vm6, %v2224_v59, %v2182_v52 }
 0x565   : > { %v2234_v62 = vsel %vm2225_vm6, %v2233_v56, %v2210_v54 }
 0x567   : > { %v2186_v63 = vpop.permute.xlu1 %2185  ;;  %v2214_v0 = vpop.permute.xlu0 %2213 }
 0x568   : > { %v2228_v3 = vsel %vm2227_vm7, %v2226_v60, %v2186_v63  ;;  %v2235_v5 = vsel %vm2227_vm7, %v2234_v62, %v2214_v0 }
 0x569   : > { %2236 = vst [vmem:[%s191_s11] sm:$0xff] %v2228_v3  ;;  %2237 = vst [vmem:[%s191_s11 + $0x8] sm:$0xff] %v2235_v5 }
 0x56a   : > { %2663 = shalt.err (!%p2660_p3)
}
 0x56b   : > { %s2664_s29 = scalar_lea.hbm %s3068_s20, 256  ;;  %s2668_s6 = scalar_lea.hbm %s3115_s4, 512 }
 0x56c   : > { %p2665_p4 = scmp.ne.s32.totalorder %s3068_s20, %s2664_s29  ;;  %p2669_p9 = scmp.lt.s32.totalorder %s3068_s20, %s3115_s4 }
 0x56d   : > { %p2670_p10 = scmp.lt.s32.totalorder %s2668_s6, %s2664_s29 }
 0x56e   : > { %p2666_p7 = pnand %p2665_p4, %p2785_p5 }
 0x56f   : > { %p2671_p11 = por %p2670_p10, %p2669_p9 }
 0x570   : > { %p2667_p8 = pneg %p2666_p7 }
 0x572   : > { %p2672_p12 = pnand %p2671_p11, %p2667_p8 }
 0x574   : > { %2675 = shalt.err (!%p2672_p12)
}
 0x575   : > { %2505 = dma.vmem_to_hbm [thread:$0]  (%p2785_p5), %s3070_s12, 256, %s3068_s20, %s2239_s19  }
 0x576 PF: > { %p2511_p13 = scmp.ge.s32.totalorder %s2710_s18, 2  ;;  %s2265_s9 = sand.u32 1, %s2698_s15  }
 0x577   : > { %s2266_s10 = scalar_lea.sflag [#allocation3], %s2265_s9 }
 0x578   : > { %p2508_p0 = pnand %p2511_p13, %p2789_p6 }
 0x57a   : > { %p2509_p1 = pneg %p2508_p0 }
 0x57c   : > { %2693 = dma.done.wait (%p2509_p1), %s2266_s10, 256  }
 0x57d   : > { %2695 = vsyncadd (%p2509_p1), %s2266_s10, 4294967040  ;;  %p14_p2 = scmp.ge.s32.totalorder %s2772_s21, 4   ;;  %s3118_s15 = smov %s2702_s16 }
 0x57e   : > { %s3119_s16 = smov %s2706_s17  ;;  %s3120_s17 = smov %s2783_s24 }
 0x57f   : > { %s3121_s18 = smov %s2772_s21  ;;  %16 = sbr.rel (!%p14_p2) target bundleno = 3 (0x3), region = 71 }
 0x584   :  { %2271 = vsyncpa [#allocation3], 1 }
 0x585   :  { %2273 = vsyncpa [#allocation3 + $0x1], 1 }

</bundles_post_ra>
